<compile_context>
chip_gen: v7x
topology: tpu7x:2x2x1
jax: 0.10.0
libtpu: 0.0.40
codegen_flags: <defaults>
</compile_context>

<pallas_src>
import functools

import jax
import jax.numpy as jnp
from jax.experimental import pallas as pl
from jax.experimental.pallas import tpu as pltpu

BASE_THRESHOLD = 0.5  # Meter.base_threshold (predict); ground-truth threshold fixed at 0.5

_LANES = 128
_SUBLANES = 8


def _cdiv(a, b):
    return -(-a // b)


def _round_up(a, b):
    return _cdiv(a, b) * b


def _meter_kernel(p_ref, t_ref, o_pt_ref, o_p_ref, o_t_ref, *,
                  tm, m_rows, num_k2, threshold):
    """grid = (num_splits, B, num_k2); input blocks are (1, tm, 128)."""
    c = pl.program_id(0)
    k = pl.program_id(2)

    @pl.when(k == 0)
    def _():
        o_pt_ref[...] = jnp.zeros_like(o_pt_ref)
        o_p_ref[...] = jnp.zeros_like(o_p_ref)
        o_t_ref[...] = jnp.zeros_like(o_t_ref)

    # Global k-block for this step.  Ragged tail rows (and the clamped duplicate
    # step on an odd k-split) get rows_valid <= their row index -> zero weight.
    gk = c * num_k2 + k
    rows_valid = m_rows - gk * tm

    # VPU: threshold in native dtype, build 0/1 bf16 masks (exact values).
    pb = p_ref[0] > threshold          # (tm, 128) bool
    tb = t_ref[0] > 0.5
    pf = pb.astype(jnp.bfloat16)
    tf = tb.astype(jnp.bfloat16)
    ptf = jnp.logical_and(pb, tb).astype(jnp.bfloat16)

    # Reduction weights: row 0 carries the row-validity mask, rows 1..7 are zero.
    sub = jax.lax.broadcasted_iota(jnp.int32, (_SUBLANES, tm), 0)
    row = jax.lax.broadcasted_iota(jnp.int32, (_SUBLANES, tm), 1)
    w = jnp.logical_and(sub == 0, row < rows_valid).astype(jnp.bfloat16)  # (8, tm)

    # MXU: (8, tm) @ (tm, 128) -> (8, 128) f32; only row 0 is nonzero.
    r_pt = jnp.dot(w, ptf, preferred_element_type=jnp.float32)
    r_p = jnp.dot(w, pf, preferred_element_type=jnp.float32)
    r_t = jnp.dot(w, tf, preferred_element_type=jnp.float32)

    # Output blocks stay resident across k (constant out index) -> accumulators.
    o_pt_ref[...] += r_pt.reshape(o_pt_ref.shape)
    o_p_ref[...] += r_p.reshape(o_p_ref.shape)
    o_t_ref[...] += r_t.reshape(o_t_ref.shape)


def meter_forward(predict, ground_truth, *, threshold=BASE_THRESHOLD,
                  target_block_bytes=4 << 20):
    """predict, ground_truth: (B, ...) float arrays (any float dtype, kept native).
    Returns the scalar f32 mean dice (Meter.forward semantics)."""
    assert predict.shape == ground_truth.shape
    B = predict.shape[0]
    p2 = predict.reshape(B, -1)
    t2 = ground_truth.reshape(B, -1)
    N = p2.shape[1]

    # Lane-ragged fallback only (N not a multiple of 128): pad the last dim up to
    # the next lane multiple.  The common case needs no padding pass at all.
    if N % _LANES != 0:
        # Zero padding must stay strictly below both (strict '>') thresholds.
        assert threshold >= 0.0
        pad = (-N) % _LANES
        p2 = jnp.pad(p2, ((0, 0), (0, pad)))
        t2 = jnp.pad(t2, ((0, 0), (0, pad)))
        N += pad
    M = N // _LANES
    p3 = p2.reshape(B, M, _LANES)   # free reshape (splits the contiguous last dim)
    t3 = t2.reshape(B, M, _LANES)

    p_bytes = jnp.dtype(p3.dtype).itemsize
    t_bytes = jnp.dtype(t3.dtype).itemsize
    itemsize = max(p_bytes, t_bytes)

    # ~target_block_bytes per input per grid step (amortizes the ~0.35us/step
    # overhead); tm is a multiple of 16 rows unless it covers the full M.
    tm_cap = max(16, (target_block_bytes // (_LANES * itemsize)) // 16 * 16)
    tm = min(tm_cap, M)
    num_k = _cdiv(M, tm)

    # Split the reduction axis across a leading grid axis of 2 so both v7x
    # TensorCores are busy even for B == 1 / odd B (no effect on v5e/v6e).
    num_splits = 2
    if num_k < 2:
        if M > 16:
            tm = _round_up(_cdiv(M, 2), 16)
            num_k = _cdiv(M, tm)
        if num_k < 2:
            num_splits = 1
    num_k2 = _cdiv(num_k, num_splits)

    kernel = functools.partial(_meter_kernel, tm=tm, m_rows=M,
                               num_k2=num_k2, threshold=threshold)

    def in_map(c, b, k):
        # Clamp so the (possible) one excess step on the odd split re-targets the
        # previous step's block (DMA elided) and is zero-weighted in-kernel.
        return (b, jnp.minimum(c * num_k2 + k, num_k - 1), 0)

    def out_map(c, b, k):
        return (c, b, 0, 0)

    part_shape = jax.ShapeDtypeStruct((num_splits, B, _SUBLANES, _LANES),
                                      jnp.float32)
    out_block = pl.BlockSpec((1, 1, _SUBLANES, _LANES), out_map)

    # Tight VMEM budget: double-buffered input blocks + bf16 mask/weight
    # temporaries + headroom for compiler-internal scratch.
    in_block_bytes = tm * _LANES * (p_bytes + t_bytes)
    tmp_bytes = 4 * tm * _LANES * 2
    vmem_limit = int(min(2 * in_block_bytes + tmp_bytes + (8 << 20), 48 << 20))

    cost = pl.CostEstimate(
        flops=int(B * M * _LANES * (6 + 6 * _SUBLANES)),
        transcendentals=0,
        bytes_accessed=int(B * M * _LANES * (p_bytes + t_bytes)
                           + 3 * num_splits * B * _SUBLANES * _LANES * 4),
    )

    pt_part, p_part, t_part = pl.pallas_call(
        kernel,
        out_shape=(part_shape, part_shape, part_shape),
        grid_spec=pltpu.PrefetchScalarGridSpec(
            num_scalar_prefetch=0,
            grid=(num_splits, B, num_k2),
            in_specs=[
                pl.BlockSpec((1, tm, _LANES), in_map),
                pl.BlockSpec((1, tm, _LANES), in_map),
            ],
            out_specs=[out_block, out_block, out_block],
        ),
        compiler_params=pltpu.CompilerParams(
            dimension_semantics=("parallel", "parallel", "arbitrary"),
            vmem_limit_bytes=vmem_limit,
        ),
        cost_estimate=cost,
    )(p3, t3)

    # Tiny epilogue in XLA: combine per-(core, batch) partial sums, dice, mean.
    pt = pt_part.sum(axis=(0, 2, 3))
    ps = p_part.sum(axis=(0, 2, 3))
    ts = t_part.sum(axis=(0, 2, 3))
    dice_pos = 2.0 * pt / jnp.maximum(ps + ts, 1e-12)
    dice_neg = (ps == 0.0).astype(jnp.float32)
    dice = jnp.where(ts == 0.0, dice_neg, dice_pos)
    return dice.mean()


def _reference(predict, ground_truth, threshold=0.5):
    B = predict.shape[0]
    p = (predict.reshape(B, -1) > threshold).astype(jnp.float32)
    t = (ground_truth.reshape(B, -1) > 0.5).astype(jnp.float32)
    t_sum = t.sum(-1)
    p_sum = p.sum(-1)
    dice_pos = 2.0 * (p * t).sum(-1) / jnp.maximum((p + t).sum(-1), 1e-12)
    dice_neg = (p_sum == 0).astype(jnp.float32)
    dice = jnp.where(t_sum == 0, dice_neg, dice_pos)
    return dice.mean()


def _check(out, ref, tag):
    assert jnp.allclose(out, ref, atol=1e-5, rtol=1e-5), (tag, out, ref)


if __name__ == "__main__":
    key = jax.random.PRNGKey(0)
    k1, k2, k3, k4, k5, k6 = jax.random.split(key, 6)

    # 1) Baseline: B=2, C=4, H=W=16 (N=1024); sample 1 all-negative truth.
    predict = jax.random.uniform(k1, (2, 4, 16, 16), dtype=jnp.float32)
    gt = (jax.random.uniform(k2, (2, 4, 16, 16), dtype=jnp.float32) > 0.7)
    gt = gt.astype(jnp.float32).at[1].set(0.0)
    out = meter_forward(predict, gt)
    jax.block_until_ready(out)
    _check(out, _reference(predict, gt), "base")

    # 2) Core-split path (num_k forced to 2), even split, f32.
    p_big = jax.random.uniform(k3, (2, 4, 64, 64), dtype=jnp.float32)
    t_big = (jax.random.uniform(k4, (2, 4, 64, 64), dtype=jnp.float32) > 0.6)
    t_big = t_big.astype(jnp.float32)
    out2 = meter_forward(p_big, t_big)
    jax.block_until_ready(out2)
    _check(out2, _reference(p_big, t_big), "split")

    # 3) Odd num_k + ragged k-tail + clamped duplicate block (tiny blocks).
    out3 = meter_forward(p_big[:, :5, :32, :40], t_big[:, :5, :32, :40],
                         target_block_bytes=16 * 128 * 4)
    jax.block_until_ready(out3)
    _check(out3, _reference(p_big[:, :5, :32, :40], t_big[:, :5, :32, :40]),
           "odd-k")

    # 4) Native bf16 inputs (no wrapper-side f32 upcast).
    out_bf = meter_forward(p_big.astype(jnp.bfloat16), t_big.astype(jnp.bfloat16))
    jax.block_until_ready(out_bf)
    _check(out_bf, _reference(p_big.astype(jnp.bfloat16).astype(jnp.float32),
                              t_big.astype(jnp.bfloat16).astype(jnp.float32)),
           "bf16")

    # 5) Lane-ragged N (N=300, not a multiple of 128) -> small pad fallback.
    p_r = jax.random.uniform(k5, (2, 3, 10, 10), dtype=jnp.float32)
    t_r = (jax.random.uniform(k6, (2, 3, 10, 10), dtype=jnp.float32) > 0.5)
    t_r = t_r.astype(jnp.float32)
    out_r = meter_forward(p_r, t_r)
    jax.block_until_ready(out_r)
    _check(out_r, _reference(p_r, t_r), "ragged")

    # 6) B=1 (megacore still split over the reduction axis).
    out_b1 = meter_forward(p_big[:1], t_big[:1])
    jax.block_until_ready(out_b1)
    _check(out_b1, _reference(p_big[:1], t_big[:1]), "b1")

    print("KERNEL_OK")
</pallas_src>

<mosaic_0001>
module attributes {stable_mosaic.version = 11 : i64} {
  func.func @_meter_kernel(%arg0: i32, %arg1: i32, %arg2: i32, %arg3: memref<1x8x128xf32, #tpu.memory_space<vmem>>, %arg4: memref<1x8x128xf32, #tpu.memory_space<vmem>>, %arg5: memref<1x1x8x128xf32, #tpu.memory_space<vmem>>, %arg6: memref<1x1x8x128xf32, #tpu.memory_space<vmem>>, %arg7: memref<1x1x8x128xf32, #tpu.memory_space<vmem>>) attributes {dimension_semantics = [#tpu.dimension_semantics<parallel>, #tpu.dimension_semantics<parallel>, #tpu.dimension_semantics<arbitrary>], iteration_bounds = array<i64: 1, 2, 1>, scalar_prefetch = 0 : i64, scratch_operands = 0 : i64, tpu.core_type = #tpu.core_type<tc>, window_params = [{transform_indices = @transform_0, window_bounds = array<i64: 1, 8, 128>}, {transform_indices = @transform_1, window_bounds = array<i64: 1, 8, 128>}, {transform_indices = @transform_2, window_bounds = array<i64: 1, 1, 8, 128>}, {transform_indices = @transform_3, window_bounds = array<i64: 1, 1, 8, 128>}, {transform_indices = @transform_4, window_bounds = array<i64: 1, 1, 8, 128>}]} {
    %c0_i32 = arith.constant 0 : i32
    %0 = arith.cmpi eq, %arg2, %c0_i32 : i32
    %1 = arith.extui %0 : i1 to i32
    %c0_i32_0 = arith.constant 0 : i32
    %2 = arith.cmpi ne, %1, %c0_i32_0 : i32
    scf.if %2 {
      %cst_36 = arith.constant 0.000000e+00 : f32
      %50 = vector.broadcast %cst_36 : f32 to vector<1x1x8x128xf32>
      %c0_37 = arith.constant 0 : index
      %c0_38 = arith.constant 0 : index
      %c0_39 = arith.constant 0 : index
      %c0_40 = arith.constant 0 : index
      %51 = vector.load %arg5[%c0_37, %c0_38, %c0_39, %c0_40] : memref<1x1x8x128xf32, #tpu.memory_space<vmem>>, vector<1x1x8x128xf32>
      tpu.vector_store %arg5[%c0_37, %c0_38, %c0_39, %c0_40], %50 {strides = array<i32>} : memref<1x1x8x128xf32, #tpu.memory_space<vmem>>, vector<1x1x8x128xf32>,
      %cst_41 = arith.constant 0.000000e+00 : f32
      %52 = vector.broadcast %cst_41 : f32 to vector<1x1x8x128xf32>
      %c0_42 = arith.constant 0 : index
      %c0_43 = arith.constant 0 : index
      %c0_44 = arith.constant 0 : index
      %c0_45 = arith.constant 0 : index
      %53 = vector.load %arg6[%c0_42, %c0_43, %c0_44, %c0_45] : memref<1x1x8x128xf32, #tpu.memory_space<vmem>>, vector<1x1x8x128xf32>
      tpu.vector_store %arg6[%c0_42, %c0_43, %c0_44, %c0_45], %52 {strides = array<i32>} : memref<1x1x8x128xf32, #tpu.memory_space<vmem>>, vector<1x1x8x128xf32>,
      %cst_46 = arith.constant 0.000000e+00 : f32
      %54 = vector.broadcast %cst_46 : f32 to vector<1x1x8x128xf32>
      %c0_47 = arith.constant 0 : index
      %c0_48 = arith.constant 0 : index
      %c0_49 = arith.constant 0 : index
      %c0_50 = arith.constant 0 : index
      %55 = vector.load %arg7[%c0_47, %c0_48, %c0_49, %c0_50] : memref<1x1x8x128xf32, #tpu.memory_space<vmem>>, vector<1x1x8x128xf32>
      tpu.vector_store %arg7[%c0_47, %c0_48, %c0_49, %c0_50], %54 {strides = array<i32>} : memref<1x1x8x128xf32, #tpu.memory_space<vmem>>, vector<1x1x8x128xf32>,
    } else {
    }
    %c1_i32 = arith.constant 1 : i32
    %3 = arith.muli %arg0, %c1_i32 : i32
    %4 = arith.addi %3, %arg2 : i32
    %c8_i32 = arith.constant 8 : i32
    %5 = arith.muli %4, %c8_i32 : i32
    %c8_i32_1 = arith.constant 8 : i32
    %6 = arith.subi %c8_i32_1, %5 : i32
    %c0 = arith.constant 0 : index
    %c0_2 = arith.constant 0 : index
    %c0_3 = arith.constant 0 : index
    %7 = vector.load %arg3[%c0, %c0_2, %c0_3] : memref<1x8x128xf32, #tpu.memory_space<vmem>>, vector<1x8x128xf32>
    %8 = vector.shape_cast %7 : vector<1x8x128xf32> to vector<8x128xf32>
    %cst = arith.constant 5.000000e-01 : f32
    %9 = vector.broadcast %cst : f32 to vector<8x128xf32>
    %10 = arith.cmpf ogt, %8, %9 : vector<8x128xf32>
    %c0_4 = arith.constant 0 : index
    %c0_5 = arith.constant 0 : index
    %c0_6 = arith.constant 0 : index
    %11 = vector.load %arg4[%c0_4, %c0_5, %c0_6] : memref<1x8x128xf32, #tpu.memory_space<vmem>>, vector<1x8x128xf32>
    %12 = vector.shape_cast %11 : vector<1x8x128xf32> to vector<8x128xf32>
    %cst_7 = arith.constant 5.000000e-01 : f32
    %13 = vector.broadcast %cst_7 : f32 to vector<8x128xf32>
    %14 = arith.cmpf ogt, %12, %13 : vector<8x128xf32>
    %15 = arith.extui %10 : vector<8x128xi1> to vector<8x128xi32>
    %16 = arith.sitofp %15 : vector<8x128xi32> to vector<8x128xf32>
    %17 = arith.truncf %16 : vector<8x128xf32> to vector<8x128xbf16>
    %18 = arith.extui %14 : vector<8x128xi1> to vector<8x128xi32>
    %19 = arith.sitofp %18 : vector<8x128xi32> to vector<8x128xf32>
    %20 = arith.truncf %19 : vector<8x128xf32> to vector<8x128xbf16>
    %21 = arith.andi %10, %14 : vector<8x128xi1>
    %22 = arith.extui %21 : vector<8x128xi1> to vector<8x128xi32>
    %23 = arith.sitofp %22 : vector<8x128xi32> to vector<8x128xf32>
    %24 = arith.truncf %23 : vector<8x128xf32> to vector<8x128xbf16>
    %25 = tpu.iota {dimensions = array<i32: 0>} : vector<8x8xi32>
    %26 = tpu.iota {dimensions = array<i32: 1>} : vector<8x8xi32>
    %c0_i32_8 = arith.constant 0 : i32
    %27 = vector.broadcast %c0_i32_8 : i32 to vector<8x8xi32>
    %28 = arith.cmpi eq, %25, %27 : vector<8x8xi32>
    %29 = vector.broadcast %6 : i32 to vector<8x8xi32>
    %30 = arith.cmpi slt, %26, %29 : vector<8x8xi32>
    %31 = arith.andi %28, %30 : vector<8x8xi1>
    %32 = arith.extui %31 : vector<8x8xi1> to vector<8x8xi32>
    %33 = arith.sitofp %32 : vector<8x8xi32> to vector<8x8xf32>
    %34 = arith.truncf %33 : vector<8x8xf32> to vector<8x8xbf16>
    %cst_9 = arith.constant dense<0.000000e+00> : vector<8x128xf32>
    %35 = tpu.matmul %34, %24, %cst_9 {dimension_numbers = #tpu.dot_dimension_numbers<[1], [0], [0], [1], [0, 0, 1, 1], [], []>} : vector<8x8xbf16>, vector<8x128xbf16>, vector<8x128xf32> -> vector<8x128xf32>
    %cst_10 = arith.constant dense<0.000000e+00> : vector<8x128xf32>
    %36 = tpu.matmul %34, %17, %cst_10 {dimension_numbers = #tpu.dot_dimension_numbers<[1], [0], [0], [1], [0, 0, 1, 1], [], []>} : vector<8x8xbf16>, vector<8x128xbf16>, vector<8x128xf32> -> vector<8x128xf32>
    %cst_11 = arith.constant dense<0.000000e+00> : vector<8x128xf32>
    %37 = tpu.matmul %34, %20, %cst_11 {dimension_numbers = #tpu.dot_dimension_numbers<[1], [0], [0], [1], [0, 0, 1, 1], [], []>} : vector<8x8xbf16>, vector<8x128xbf16>, vector<8x128xf32> -> vector<8x128xf32>
    %c0_12 = arith.constant 0 : index
    %c0_13 = arith.constant 0 : index
    %c0_14 = arith.constant 0 : index
    %c0_15 = arith.constant 0 : index
    %38 = vector.load %arg5[%c0_12, %c0_13, %c0_14, %c0_15] : memref<1x1x8x128xf32, #tpu.memory_space<vmem>>, vector<1x1x8x128xf32>
    %39 = vector.shape_cast %35 : vector<8x128xf32> to vector<1x1x8x128xf32>
    %40 = arith.addf %38, %39 : vector<1x1x8x128xf32>
    %c0_16 = arith.constant 0 : index
    %c0_17 = arith.constant 0 : index
    %c0_18 = arith.constant 0 : index
    %c0_19 = arith.constant 0 : index
    %41 = vector.load %arg5[%c0_16, %c0_17, %c0_18, %c0_19] : memref<1x1x8x128xf32, #tpu.memory_space<vmem>>, vector<1x1x8x128xf32>
    tpu.vector_store %arg5[%c0_16, %c0_17, %c0_18, %c0_19], %40 {strides = array<i32>} : memref<1x1x8x128xf32, #tpu.memory_space<vmem>>, vector<1x1x8x128xf32>,
    %c0_20 = arith.constant 0 : index
    %c0_21 = arith.constant 0 : index
    %c0_22 = arith.constant 0 : index
    %c0_23 = arith.constant 0 : index
    %42 = vector.load %arg6[%c0_20, %c0_21, %c0_22, %c0_23] : memref<1x1x8x128xf32, #tpu.memory_space<vmem>>, vector<1x1x8x128xf32>
    %43 = vector.shape_cast %36 : vector<8x128xf32> to vector<1x1x8x128xf32>
    %44 = arith.addf %42, %43 : vector<1x1x8x128xf32>
    %c0_24 = arith.constant 0 : index
    %c0_25 = arith.constant 0 : index
    %c0_26 = arith.constant 0 : index
    %c0_27 = arith.constant 0 : index
    %45 = vector.load %arg6[%c0_24, %c0_25, %c0_26, %c0_27] : memref<1x1x8x128xf32, #tpu.memory_space<vmem>>, vector<1x1x8x128xf32>
    tpu.vector_store %arg6[%c0_24, %c0_25, %c0_26, %c0_27], %44 {strides = array<i32>} : memref<1x1x8x128xf32, #tpu.memory_space<vmem>>, vector<1x1x8x128xf32>,
    %c0_28 = arith.constant 0 : index
    %c0_29 = arith.constant 0 : index
    %c0_30 = arith.constant 0 : index
    %c0_31 = arith.constant 0 : index
    %46 = vector.load %arg7[%c0_28, %c0_29, %c0_30, %c0_31] : memref<1x1x8x128xf32, #tpu.memory_space<vmem>>, vector<1x1x8x128xf32>
    %47 = vector.shape_cast %37 : vector<8x128xf32> to vector<1x1x8x128xf32>
    %48 = arith.addf %46, %47 : vector<1x1x8x128xf32>
    %c0_32 = arith.constant 0 : index
    %c0_33 = arith.constant 0 : index
    %c0_34 = arith.constant 0 : index
    %c0_35 = arith.constant 0 : index
    %49 = vector.load %arg7[%c0_32, %c0_33, %c0_34, %c0_35] : memref<1x1x8x128xf32, #tpu.memory_space<vmem>>, vector<1x1x8x128xf32>
    tpu.vector_store %arg7[%c0_32, %c0_33, %c0_34, %c0_35], %48 {strides = array<i32>} : memref<1x1x8x128xf32, #tpu.memory_space<vmem>>, vector<1x1x8x128xf32>,
    return
  }
  func.func @transform_0(%arg0: i32, %arg1: i32, %arg2: i32) -> (i32, i32, i32) {
    %c1_i32 = arith.constant 1 : i32
    %0 = arith.muli %arg0, %c1_i32 : i32
    %1 = arith.addi %0, %arg2 : i32
    %c0_i32 = arith.constant 0 : i32
    %2 = arith.minsi %1, %c0_i32 : i32
    %c0_i32_0 = arith.constant 0 : i32
    %c0_i32_1 = arith.constant 0 : i32
    return %arg1, %2, %c0_i32_0 : i32, i32, i32
  }
  func.func @transform_1(%arg0: i32, %arg1: i32, %arg2: i32) -> (i32, i32, i32) {
    %c1_i32 = arith.constant 1 : i32
    %0 = arith.muli %arg0, %c1_i32 : i32
    %1 = arith.addi %0, %arg2 : i32
    %c0_i32 = arith.constant 0 : i32
    %2 = arith.minsi %1, %c0_i32 : i32
    %c0_i32_0 = arith.constant 0 : i32
    %c0_i32_1 = arith.constant 0 : i32
    return %arg1, %2, %c0_i32_0 : i32, i32, i32
  }
  func.func @transform_2(%arg0: i32, %arg1: i32, %arg2: i32) -> (i32, i32, i32, i32) {
    %c0_i32 = arith.constant 0 : i32
    %c0_i32_0 = arith.constant 0 : i32
    %c0_i32_1 = arith.constant 0 : i32
    return %arg0, %arg1, %c0_i32, %c0_i32_0 : i32, i32, i32, i32
  }
  func.func @transform_3(%arg0: i32, %arg1: i32, %arg2: i32) -> (i32, i32, i32, i32) {
    %c0_i32 = arith.constant 0 : i32
    %c0_i32_0 = arith.constant 0 : i32
    %c0_i32_1 = arith.constant 0 : i32
    return %arg0, %arg1, %c0_i32, %c0_i32_0 : i32, i32, i32, i32
  }
  func.func @transform_4(%arg0: i32, %arg1: i32, %arg2: i32) -> (i32, i32, i32, i32) {
    %c0_i32 = arith.constant 0 : i32
    %c0_i32_0 = arith.constant 0 : i32
    %c0_i32_1 = arith.constant 0 : i32
    return %arg0, %arg1, %c0_i32, %c0_i32_0 : i32, i32, i32, i32
  }
}

</mosaic_0001>

<bundles_post_ra>
// kernel: tpu_custom_call.1
= control target key start
LH: loop header
LB: loop body
LE: loop exit
PB: predicated region body
PF: predicated region fallthrough
CT: control target
= control target key end

     0   :  { %10 = vsyncpa [#allocation3], 0  ;;  %s1407_s0 = inlined_call_operand.hbm [shape: f32[2,8,128], index: 0, kind: input, shape index: {}]   ;;  %s1408_s1 = inlined_call_operand.hbm [shape: f32[2,8,128], index: 1, kind: input, shape index: {}]   ;;  %s1409_s2 = inlined_call_operand.hbm [shape: f32[1,2,8,128], index: 2, kind: output, shape index: {0}]   ;;  %s1410_s3 = inlined_call_operand.hbm [shape: f32[1,2,8,128], index: 3, kind: output, shape index: {1}]   ;;  %s1411_s4 = inlined_call_operand.hbm [shape: f32[1,2,8,128], index: 4, kind: output, shape index: {2}]  }
   0x1   :  { %12 = vsyncpa [#allocation3 + $0x1], 0 }
   0x2   :  { %13 = vsyncpa [#allocation6], 0 }
   0x3   :  { %15 = vsyncpa [#allocation6 + $0x1], 0 }
   0x4   :  { %16 = vsyncpa [#allocation4], 0 }
   0x5   :  { %18 = vsyncpa [#allocation4 + $0x1], 0 }
   0x6   :  { %19 = vsyncpa [#allocation9], 0 }
   0x7   :  { %21 = vsyncpa [#allocation9 + $0x1], 0  ;;  %s1103_s15 = smov 0   ;;  %s1105_s16 = smov 0  }
   0x8   :  { %s1107_s17 = smov 0   ;;  %s1109_s18 = smov 0  }
   0x9   :  { %s1111_s19 = smov 0   ;;  %s1113_s20 = smov 0  }
   0xa LB: > { %s1134_s21 = sadd.s32 4294967295, %s1069_s20   ;;  %s1412_s22 = sadd.s32 4294967294, %s1069_s20   ;;  %s1069_s20 = sphi %s1113_s20, %s27_s20   ;;  %s1065_s19 = sphi %s1111_s19, %s1433_s19   ;;  %s1061_s18 = sphi %s1109_s18, %s1432_s18   ;;  %s1057_s17 = sphi %s1107_s17, %s1431_s17   ;;  %s1053_s16 = sphi %s1105_s16, %s1430_s16   ;;  %s1049_s15 = sphi %s1103_s15, %s1429_s15  }
   0xb   : > { %s42_s23 = sadd.s32 1, %s1065_s19  ;;  %s61_s24 = sadd.s32 1, %s1057_s17 }
   0xc   : > { %p44_p0 = scmp.ge.s32.totalorder %s42_s23, 2  ;;  %p68_p1 = scmp.ne.s32.totalorder %s1057_s17, %s1053_s16 }
   0xd   : > { %p69_p2 = scmp.eq.s32.totalorder %s1069_s20, 0  ;;  %p74_p3 = scmp.ne.s32.totalorder %s1053_s16, %s1049_s15 }
   0xe   : > { %s1435_s23 = smov (%p44_p0, %s42_s23), 0  ;;  %p75_p5 = scmp.eq.s32.totalorder %s1134_s21, 0 }
   0xf   : > { %p1146_p4 = por %p69_p2, %p68_p1  ;;  %s56_s26 = ssub.s32 %s1065_s19, %s1435_s23 }
  0x10   : > { %p134_p6 = scmp.eq.s32.totalorder %s1134_s21, 1  ;;  %p59_p7 = scmp.eq.s32.totalorder %s56_s26, 0 }
  0x11   : > { %p1154_p8 = por %p75_p5, %p74_p3  ;;  %p140_p10 = scmp.eq.s32.totalorder %s1412_s22, 1 }
  0x12   : > { %p1158_p9 = por %p134_p6, %p68_p1  ;;  %p811_p13 = scmp.lt.s32.totalorder %s1069_s20, 2 }
  0x13   : > { %s1416_s27 = scalar_select %p1154_p8, 1, 0 }
  0x14   : > { %s1417_s28 = scalar_select %p1158_p9, 1, 0 }
  0x15   : > { %s1165_s29 = scalar_select %p59_p7, %s1057_s17, %s61_s24  }
  0x16   : > { %p1167_p11 = por %p140_p10, %p74_p3  ;;  %s1174_s5 = sand.u32 1, %s1057_s17  }
  0x17   : > { %s735_s6 = sshll.u32 %s1174_s5, 3  ;;  %s736_s7 = sshll.u32 %s1065_s19, 7 }
  0x18   : > { %s1418_s30 = scalar_select %p1167_p11, 1, 0 }
  0x19   : > { %s1183_s10 = scalar_lea.hbm %s1407_s0, %s736_s7  ;;  %s220_s11 = scalar_lea.vmem [#allocation2], %s735_s6 }
  0x1a   : > { %s231_s12 = sshll.u32 %s220_s11, 4  ;;  %p1191_p0 = pnand %p811_p13, %p1146_p4  ;;  %s1187_s12 = int_to_ptr.vmem [resolvable:$true] %s231_s12 }
  0x1b   : > { %s217_s14 = scalar_lea.sflag [#allocation3], %s1174_s5  ;;  %s863_s24 = scalar_lea.hbm %s1183_s10, 128 }
  0x1c   : > { %p864_p3 = scmp.ne.s32.totalorder %s1183_s10, %s863_s24  ;;  %p865_p5 = pneg %p1191_p0 }
  0x1d   : > { %s868_s25 = scalar_lea.hbm %s1407_s0, 256  ;;  %p869_p4 = scmp.lt.u32.totalorder %s1183_s10, %s1407_s0 }
  0x1e   : > { %p866_p6 = pnand %p865_p5, %p864_p3  ;;  %p870_p10 = scmp.lt.u32.totalorder %s868_s25, %s863_s24 }
  0x1f   : > { %p872_p12 = scmp.lt.u32.totalorder %s863_s24, %s1183_s10 }
  0x20   : > { %p867_p7 = pneg %p866_p6  ;;  %p871_p13 = por %p870_p10, %p869_p4 }
  0x22   : > { %p873_p1 = por %p872_p12, %p871_p13 }
  0x24   : > { %p874_p2 = pnand %p873_p1, %p867_p7 }
  0x26   : > { %877 = shalt.err (!%p874_p2)
}
  0x27   : > { %s878_s22 = scalar_lea.vmem %s1187_s12, 128  ;;  %s1071_s26 = smov [#allocation2]  }
  0x28   : > { %p879_p3 = scmp.ne.s32.totalorder %s1187_s12, %s878_s22  ;;  %s883_s8 = sshll.u32 %s1071_s26, 4  ;;  %s884_s8 = int_to_ptr.vmem [resolvable:$false] %s883_s8 }
  0x29   : > { %s885_s9 = scalar_lea.vmem %s884_s8, 256  ;;  %p886_p9 = scmp.lt.s32.totalorder %s1187_s12, %s884_s8 }
  0x2a   : > { %p881_p6 = pnand %p879_p3, %p865_p5  ;;  %p887_p4 = scmp.lt.s32.totalorder %s885_s9, %s878_s22 }
  0x2c   : > { %p882_p11 = pneg %p881_p6  ;;  %p888_p10 = por %p887_p4, %p886_p9 }
  0x2e   : > { %p889_p12 = pnand %p888_p10, %p882_p11 }
  0x30   : > { %892 = shalt.err (!%p889_p12)
}
  0x31   : > { %797 = dma.hbm_to_vmem [thread:$0]  (!%p1191_p0), %s1183_s10, 128, %s1187_s12, %s217_s14  }
  0x32   : > { %p1420_p1 = scmp.lt.s32.totalorder %s1069_s20, 3  ;;  %p1421_p2 = scmp.ge.s32.totalorder %s1069_s20, 1 }
  0x33   : > { %s1236_s11 = scalar_lea.hbm %s1408_s1, %s736_s7  ;;  %s242_s26 = scalar_lea.vmem [#allocation5], %s735_s6 }
  0x34   : > { %p1227_p7 = pnand %p1421_p2, %p1420_p1  ;;  %s253_s8 = sshll.u32 %s242_s26, 4  ;;  %s254_s8 = int_to_ptr.vmem [resolvable:$true] %s253_s8 }
  0x35   : > { %s239_s10 = scalar_lea.sflag [#allocation6], %s1174_s5  ;;  %s893_s12 = scalar_lea.hbm %s1236_s11, 128 }
  0x36   : > { %s1422_s24 = scalar_select %p1227_p7, 1, 0 }
  0x37   : > { %p894_p9 = scmp.ne.s32.totalorder %s1236_s11, %s893_s12  ;;  %s898_s7 = scalar_lea.hbm %s1408_s1, 256 }
  0x38   : > { %p899_p3 = scmp.lt.u32.totalorder %s1236_s11, %s1408_s1  ;;  %p900_p6 = scmp.lt.u32.totalorder %s898_s7, %s893_s12 }
  0x39   : > { %p896_p11 = pnand %p894_p9, %p865_p5  ;;  %p902_p10 = scmp.lt.u32.totalorder %s893_s12, %s1236_s11 }
  0x3a   : > { %p901_p4 = por %p900_p6, %p899_p3 }
  0x3b   : > { %p897_p13 = pneg %p896_p11 }
  0x3c   : > { %p903_p12 = por %p902_p10, %p901_p4 }
  0x3e   : > { %p904_p1 = pnand %p903_p12, %p897_p13 }
  0x40   : > { %907 = shalt.err (!%p904_p1)
}
  0x41   : > { %s908_s5 = scalar_lea.vmem %s254_s8, 128  ;;  %s1072_s6 = smov [#allocation5]  }
  0x42   : > { %p909_p2 = scmp.ne.s32.totalorder %s254_s8, %s908_s5  ;;  %s913_s26 = sshll.u32 %s1072_s6, 4  ;;  %s914_s26 = int_to_ptr.vmem [resolvable:$false] %s913_s26 }
  0x43   : > { %s915_s14 = scalar_lea.vmem %s914_s26, 256  ;;  %p916_p8 = scmp.lt.s32.totalorder %s254_s8, %s914_s26 }
  0x44   : > { %p911_p9 = pnand %p909_p2, %p865_p5  ;;  %p917_p7 = scmp.lt.s32.totalorder %s915_s14, %s908_s5 }
  0x46   : > { %p912_p11 = pneg %p911_p9  ;;  %p918_p3 = por %p917_p7, %p916_p8 }
  0x48   : > { %p919_p6 = pnand %p918_p3, %p912_p11 }
  0x4a   : > { %922 = shalt.err (!%p919_p6)
}
  0x4b   : > { %800 = dma.hbm_to_vmem [thread:$0]  (!%p1191_p0), %s1236_s11, 128, %s254_s8, %s239_s10  }
  0x4c   : > { %p1423_p13 = scmp.ne.s32.totalorder %s1422_s24, 0 }
  0x4d   : > { %s1263_s12 = sand.u32 (!%p1423_p13), 1, %s1053_s16   ;;  %p1424_p8 = scmp.ne.s32.totalorder (!%p1423_p13), %s1416_s27, 0 }
  0x4e   : > { %262 = sbr.rel (%p1423_p13) target bundleno = 373 (0x175), region = 28  ;;  %s1266_s9 = sshll.u32 (!%p1423_p13), %s1263_s12, 3 }
  0x4f   : > { %s265_s7 = scalar_lea.sflag (!%p1423_p13), [#allocation3], %s1263_s12  ;;  %s268_s22 = scalar_lea.vmem (!%p1423_p13), [#allocation2], %s1266_s9 }
  0x55   : > { %1032 = dma.done.wait (%p1424_p8), %s265_s7, 128  }
  0x56   : > { %1034 = vsyncadd (%p1424_p8), %s265_s7, 4294967168  ;;  %s274_s13 = scalar_lea.sflag [#allocation6], %s1263_s12  ;;  %s277_s24 = scalar_lea.vmem [#allocation5], %s1266_s9 }
  0x57   : > { %1036 = dma.done.wait (%p1424_p8), %s274_s13, 128  }
  0x58   : > { %1038 = vsyncadd (%p1424_p8), %s274_s13, 4294967168  ;;  %v348_v0 = vlaneseq  ;;  %v1073_v1 = vmov 0.0   ;;  %vm1074_vm0 = vmmov 0   ;;  %v334_v4 = vld [vmem:[%s268_s22] sm:$0xff]  ;;  %v336_v5 = vld [vmem:[%s277_s24] sm:$0xff]  ;;  %vm363_vm7 = vcmask 1043456  }
  0x59   : > { %766 = vmatprep.subr.bf16.mxu0 %v1073_v1  ;;  %768 = vmatprep.mubr.msk.bf16.mxu0 %vm1074_vm0, %v1073_v1  ;;  %vm335_vm4 = vcmp.gt.f32.partialorder %v334_v4, 0.5  ;;  %vm337_vm5 = vcmp.gt.f32.partialorder %v336_v5, 0.5  ;;  %vm359_vm8 = vcmask 64512   ;;  %s507_s27 = sand.u32 1, %s1134_s21   ;;  %s1285_s11 = sshll.u32 %s1061_s18, 7 }
  0x5a   : > { %v349_v2 = vshrl.u32 %v348_v0, 7  ;;  %v351_v3 = vand.u32 127, %v348_v0  ;;  %772 = vmatprep.subr.bf16.mxu1 %v1073_v1  ;;  %774 = vmatprep.mubr.msk.bf16.mxu1 %vm1074_vm0, %v1073_v1  ;;  %vm344_vm6 = vmand %vm335_vm4, %vm337_vm5  ;;  %v746_v6 = vsel %vm337_vm5, 1.0, %v1073_v1  ;;  %v745_v7 = vsel %vm335_vm4, 1.0, %v1073_v1  ;;  %s309_s8 = scalar_lea.vmem [#allocation8], %s1266_s9  ;;  %s302_s25 = scalar_lea.vmem [#allocation7], %s1266_s9 }
  0x5b   : > { %v747_v8 = vsel %vm344_vm6, 1.0, %v1073_v1  ;;  %v340_v10 = vpack.c.bf16 %v745_v7, %v745_v7  ;;  %v343_v12 = vpack.c.bf16 %v746_v6, %v746_v6  ;;  %s543_s10 = sshll.u32 %s309_s8, 4  ;;  %s528_s5 = sshll.u32 %s302_s25, 4  ;;  %s1295_s10 = int_to_ptr.vmem [resolvable:$true] %s543_s10  ;;  %s1303_s5 = int_to_ptr.vmem [resolvable:$true] %s528_s5 }
  0x5c   : > { %vm352_vm1 = vcmp.eq.s32.totalorder %v349_v2, 0  ;;  %vm354_vm2 = vcmp.lt.s32.totalorder %v351_v3, 8  ;;  %v347_v11 = vpack.c.bf16 %v747_v8, %v747_v8  ;;  %s1293_s14 = scalar_lea.hbm %s1410_s3, %s1285_s11  ;;  %s1301_s7 = scalar_lea.hbm %s1409_s2, %s1285_s11 }
  0x5d   : > { %vm355_vm3 = vmand %vm352_vm1, %vm354_vm2  ;;  %v408_v13 = vsel %vm363_vm7, %v340_v10, 0  ;;  %v451_v16 = vsel %vm363_vm7, %v343_v12, 0  ;;  %s1305_s22 = scalar_lea.sflag [#allocation9], %s507_s27  ;;  %s923_s13 = scalar_lea.vmem %s1295_s10, 128 }
  0x5e   : > { %v748_v9 = vsel %vm355_vm3, 1.0, %v1073_v1  ;;  %v365_v14 = vsel %vm363_vm7, %v347_v11, 0  ;;  %773 = vmatpush3.bf16.msra.mxu1 %v408_v13  ;;  %p924_p0 = scmp.ne.s32.totalorder %s1295_s10, %s923_s13  ;;  %p1425_p5 = scmp.ne.s32.totalorder %s1417_s28, 0 }
  0x5f   : > { %v358_v15 = vpack.c.bf16 %v748_v9, %v748_v9  ;;  %767 = vmatpush3.bf16.msra.mxu0 %v365_v14  ;;  %s1075_s24 = smov [#allocation8]  }
  0x60   : > { %778 = vmatprep.subr.bf16.mxu0 %v1073_v1  ;;  %p925_p7 = pnand %p924_p0, %p1425_p5  ;;  %s927_s6 = sshll.u32 %s1075_s24, 4  ;;  %s928_s6 = int_to_ptr.vmem [resolvable:$false] %s927_s6 }
  0x61   : > { %775 = vmatmul.mubr.msk.bf16.vlgmr.msra.gmra.mrb[0].mxu1 %vm359_vm8, %v358_v15  ;;  %s929_s26 = scalar_lea.vmem %s928_s6, 256  ;;  %p930_p10 = scmp.lt.s32.totalorder %s1295_s10, %s928_s6 }
  0x62   : > { %769 = vmatmul.mubr.msk.bf16.vlgmr.msra.gmra.mrb[0].mxu0 %vm359_vm8, %v358_v15  ;;  %p926_p4 = pneg %p925_p7  ;;  %p931_p12 = scmp.lt.s32.totalorder %s929_s26, %s923_s13 }
  0x63   : > { %779 = vmatpush3.bf16.msra.mxu0 %v451_v16  ;;  %780 = vmatprep.mubr.msk.bf16.mxu0 %vm1074_vm0, %v1073_v1 }
  0x64   : > { %p932_p1 = por %p931_p12, %p930_p10 }
  0x66   : > { %p933_p2 = pnand %p932_p1, %p926_p4 }
  0x6a   : > { %781 = vmatmul.mubr.msk.bf16.vlgmr.msra.gmra.mrb[4].mxu0 %vm359_vm8, %v358_v15 }
 0x134   : > { %v444_v17 = vpop.f32.mrb[0].mxu1 }
 0x135   : > { %v401_v18 = vpop.f32.mrb[0].mxu0  ;;  %v776_v19 = vpop.f32.mrb[1].mxu1  ;;  %498 = vst [vmem:[%s309_s8] sm:$0xff] %v444_v17 }
 0x136   : > { %v770_v20 = vpop.f32.mrb[1].mxu0  ;;  %v447_v21 = vpop.f32.mrb[2].mxu1  ;;  %495 = vst [vmem:[%s302_s25] sm:$0xff] %v401_v18 }
 0x137   : > { %v404_v22 = vpop.f32.mrb[2].mxu0  ;;  %v777_v23 = vpop.f32.mrb[3].mxu1 }
 0x138   : > { %v771_v24 = vpop.f32.mrb[3].mxu0 }
 0x139   : > { %936 = shalt.err (!%p933_p2)
}
 0x13a   : > { %s937_s27 = scalar_lea.hbm %s1293_s14, 128  ;;  %s941_s18 = scalar_lea.hbm %s1410_s3, 256 }
 0x13b   : > { %p938_p9 = scmp.ne.s32.totalorder %s1293_s14, %s937_s27  ;;  %p942_p6 = scmp.lt.u32.totalorder %s1293_s14, %s1410_s3 }
 0x13c   : > { %p943_p13 = scmp.lt.u32.totalorder %s941_s18, %s937_s27  ;;  %p945_p0 = scmp.lt.u32.totalorder %s937_s27, %s1293_s14 }
 0x13d   : > { %p939_p11 = pnand %p938_p9, %p1425_p5 }
 0x13e   : > { %p944_p8 = por %p943_p13, %p942_p6 }
 0x13f   : > { %p940_p3 = pneg %p939_p11 }
 0x140   : > { %p946_p7 = por %p945_p0, %p944_p8 }
 0x142   : > { %p947_p4 = pnand %p946_p7, %p940_p3 }
 0x144   : > { %950 = shalt.err (!%p947_p4)
}
 0x145   : > { %789 = dma.vmem_to_hbm [thread:$0]  (%p1425_p5), %s1295_s10, 128, %s1293_s14, %s1305_s22  }
 0x146   : > { %s503_s13 = scalar_lea.sflag [#allocation4], %s1263_s12  ;;  %s951_s6 = scalar_lea.vmem %s1303_s5, 128 }
 0x147   : > { %p952_p10 = scmp.ne.s32.totalorder %s1303_s5, %s951_s6  ;;  %s1076_s26 = smov [#allocation7]  }
 0x148   : > { %s955_s27 = sshll.u32 %s1076_s26, 4  ;;  %s956_s27 = int_to_ptr.vmem [resolvable:$false] %s955_s27 }
 0x149   : > { %p953_p12 = pnand %p952_p10, %p1425_p5  ;;  %s957_s8 = scalar_lea.vmem %s956_s27, 256 }
 0x14a   : > { %p958_p2 = scmp.lt.s32.totalorder %s1303_s5, %s956_s27  ;;  %p959_p9 = scmp.lt.s32.totalorder %s957_s8, %s951_s6 }
 0x14b   : > { %p954_p1 = pneg %p953_p12 }
 0x14c   : > { %p960_p11 = por %p959_p9, %p958_p2 }
 0x14e   : > { %p961_p3 = pnand %p960_p11, %p954_p1 }
 0x150   : > { %964 = shalt.err (!%p961_p3)
}
 0x151   : > { %s965_s12 = scalar_lea.hbm %s1301_s7, 128  ;;  %s969_s25 = scalar_lea.hbm %s1409_s2, 256 }
 0x152   : > { %p966_p6 = scmp.ne.s32.totalorder %s1301_s7, %s965_s12  ;;  %p970_p0 = scmp.lt.u32.totalorder %s1301_s7, %s1409_s2 }
 0x153   : > { %p971_p7 = scmp.lt.u32.totalorder %s969_s25, %s965_s12  ;;  %p973_p10 = scmp.lt.u32.totalorder %s965_s12, %s1301_s7 }
 0x154   : > { %p967_p13 = pnand %p966_p6, %p1425_p5 }
 0x155   : > { %p972_p4 = por %p971_p7, %p970_p0 }
 0x156   : > { %p968_p8 = pneg %p967_p13 }
 0x157   : > { %p974_p12 = por %p973_p10, %p972_p4 }
 0x159   : > { %p975_p1 = pnand %p974_p12, %p968_p8 }
 0x15b   : > { %978 = shalt.err (!%p975_p1)
}
 0x15c   : > { %788 = dma.vmem_to_hbm [thread:$0]  (%p1425_p5), %s1303_s5, 128, %s1301_s7, %s503_s13   ;;  %v487_v25 = vpop.f32.mrb[4].mxu0 }
 0x15d   : > { %s316_s24 = scalar_lea.vmem [#allocation10], %s1266_s9  ;;  %v782_v26 = vpop.f32.mrb[5].mxu0  ;;  %s1356_s8 = scalar_lea.hbm %s1411_s4, %s1285_s11 }
 0x15e   : > { %s558_s6 = sshll.u32 %s316_s24, 4  ;;  %v490_v27 = vpop.f32.mrb[6].mxu0  ;;  %501 = vst [vmem:[%s316_s24] sm:$0xff] %v487_v25  ;;  %s1077_s9 = smov [#allocation10]   ;;  %s1358_s6 = int_to_ptr.vmem [resolvable:$true] %s558_s6 }
 0x15f   : > { %v783_v28 = vpop.f32.mrb[7].mxu0  ;;  %s979_s12 = scalar_lea.vmem %s1358_s6, 128  ;;  %s983_s5 = sshll.u32 %s1077_s9, 4  ;;  %s984_s5 = int_to_ptr.vmem [resolvable:$false] %s983_s5 }
 0x160   : > { %p980_p2 = scmp.ne.s32.totalorder %s1358_s6, %s979_s12  ;;  %s985_s7 = scalar_lea.vmem %s984_s5, 256 }
 0x161   : > { %p986_p3 = scmp.lt.s32.totalorder %s1358_s6, %s984_s5  ;;  %p987_p6 = scmp.lt.s32.totalorder %s985_s7, %s979_s12 }
 0x162   : > { %p981_p9 = pnand %p980_p2, %p1425_p5 }
 0x163   : > { %p988_p13 = por %p987_p6, %p986_p3 }
 0x164   : > { %p982_p11 = pneg %p981_p9 }
 0x166   : > { %p989_p8 = pnand %p988_p13, %p982_p11 }
 0x168   : > { %992 = shalt.err (!%p989_p8)
}
 0x169   : > { %s993_s11 = scalar_lea.hbm %s1356_s8, 128  ;;  %s997_s14 = scalar_lea.hbm %s1411_s4, 256 }
 0x16a   : > { %p994_p0 = scmp.ne.s32.totalorder %s1356_s8, %s993_s11  ;;  %p998_p10 = scmp.lt.u32.totalorder %s1356_s8, %s1411_s4 }
 0x16b   : > { %p999_p12 = scmp.lt.u32.totalorder %s997_s14, %s993_s11  ;;  %p1001_p2 = scmp.lt.u32.totalorder %s993_s11, %s1356_s8 }
 0x16c   : > { %p995_p7 = pnand %p994_p0, %p1425_p5 }
 0x16d   : > { %p1000_p1 = por %p999_p12, %p998_p10 }
 0x16e   : > { %p996_p4 = pneg %p995_p7 }
 0x16f   : > { %p1002_p9 = por %p1001_p2, %p1000_p1 }
 0x171   : > { %p1003_p11 = pnand %p1002_p9, %p996_p4 }
 0x173   : > { %1006 = shalt.err (!%p1003_p11)
}
 0x174   : > { %790 = dma.vmem_to_hbm [thread:$0]  (%p1425_p5), %s1358_s6, 128, %s1356_s8, %s1305_s22  }
 0x175 PF: > { %s570_s21 = sand.u32 1, %s1049_s15   ;;  %p1426_p3 = scmp.ne.s32.totalorder %s1418_s30, 0 }
 0x176   : > { %p1427_p6 = scmp.ge.s32.totalorder %s1069_s20, 2  ;;  %s571_s24 = scalar_lea.sflag [#allocation4], %s570_s21 }
 0x178   : > { %p802_p13 = pnand %p1427_p6, %p1426_p3 }
 0x17a   : > { %1040 = dma.done.wait (!%p802_p13), %s571_s24, 128  }
 0x17b   : > { %1042 = vsyncadd (!%p802_p13), %s571_s24, 4294967168  ;;  %s1428_s26 = sadd.s32 4294967294, %s1069_s20  }
 0x17c   : > { %s579_s27 = sand.u32 1, %s1428_s26  }
 0x17d   : > { %s580_s12 = scalar_lea.sflag [#allocation9], %s579_s27 }
 0x17e   : > { %1044 = dma.done.wait (!%p802_p13), %s580_s12, 256  }
 0x17f   : > { %1046 = vsyncadd (!%p802_p13), %s580_s12, 4294967040  ;;  %s27_s20 = sadd.s32 1, %s1069_s20   ;;  %s1429_s15 = smov %s1053_s16 }
 0x180   : > { %p24_p5 = scmp.ge.s32.totalorder %s27_s20, 4   ;;  %s1430_s16 = smov %s1057_s17 }
 0x181   : > { %s1431_s17 = smov %s1165_s29  ;;  %s1432_s18 = smov %s1065_s19 }
 0x182   : > { %s1433_s19 = smov %s1435_s23  ;;  %26 = sbr.rel (!%p24_p5) target bundleno = 10 (0xa), region = 122 }
 0x189   :  { %594 = vsyncpa [#allocation3], 1 }
 0x18a   :  { %596 = vsyncpa [#allocation3 + $0x1], 1 }
 0x18b   :  { %597 = vsyncpa [#allocation6], 1 }
 0x18c   :  { %599 = vsyncpa [#allocation6 + $0x1], 1 }
 0x18d   :  { %600 = vsyncpa [#allocation4], 1 }
 0x18e   :  { %602 = vsyncpa [#allocation4 + $0x1], 1 }
 0x18f   :  { %603 = vsyncpa [#allocation9], 1 }
 0x190   :  { %605 = vsyncpa [#allocation9 + $0x1], 1 }

</bundles_post_ra>
